<compile_context>
chip_gen: v5e
topology: v5e:2x2
jax: 0.10.0
libtpu: 0.0.40
codegen_flags: <defaults>
</compile_context>

<pallas_src>
import functools

import jax
import jax.numpy as jnp
from jax.experimental import pallas as pl
from jax.experimental.pallas import tpu as pltpu

LN_EPS = 1e-5  # torch.nn.LayerNorm default eps


def _round_up(x, m):
    return (x + m - 1) // m * m


def _vmem_capacity_bytes():
    """Physical VMEM of a TensorCore (v5e/v6e: 128 MiB, v7x: 64 MiB).
    Falls back to the smallest production value so we never over-commit."""
    try:
        cap = getattr(pltpu.get_tpu_info(), "vmem_capacity_bytes", None)
        if cap:
            return int(cap)
    except Exception:
        pass
    return 64 << 20


@functools.lru_cache(maxsize=None)
def _single_buffer_supported():
    """One-time feature probe: does this build accept pl.Buffered(1)
    single-buffering of constant-index operands?  Probing a tiny throwaway
    kernel keeps the real kernel compile free of broad try/excepts."""
    try:
        def _copy(x_ref, o_ref):
            o_ref[...] = x_ref[...]

        f = pl.pallas_call(
            _copy,
            out_shape=jax.ShapeDtypeStruct((8, 128), jnp.float32),
            grid_spec=pltpu.PrefetchScalarGridSpec(
                num_scalar_prefetch=0,
                grid=(1,),
                in_specs=[pl.BlockSpec((8, 128), lambda i: (0, 0),
                                       pipeline_mode=pl.Buffered(1))],
                out_specs=pl.BlockSpec((8, 128), lambda i: (0, 0)),
            ),
        )
        jax.block_until_ready(f(jnp.zeros((8, 128), jnp.float32)))
        return True
    except Exception:
        return False


def _epilogue(y, p_ref, o_ref, *, use_norm, true_h, hp):
    """bias add -> (optional) LayerNorm + ReLU -> store.  y is f32 (tile_b, Hp)."""
    y = y + p_ref[0:1, :]                       # bias (padded cols stay exactly 0)
    if use_norm:
        inv_h = 1.0 / float(true_h)
        mean = jnp.sum(y, axis=-1, keepdims=True) * inv_h
        c = y - mean
        if hp != true_h:
            # Mask padded hidden columns out of the variance (they hold -mean).
            col = jax.lax.broadcasted_iota(jnp.int32, y.shape, 1)
            c = jnp.where(col < true_h, c, 0.0)
        var = jnp.sum(c * c, axis=-1, keepdims=True) * inv_h   # centered two-pass
        y = c * jax.lax.rsqrt(var + LN_EPS)
        y = y * p_ref[1:2, :] + p_ref[2:3, :]   # gamma/beta (0 in padded cols)
        y = jnp.maximum(y, 0.0)                 # ReLU (only under use_norm, as in torch)
    o_ref[...] = y.astype(o_ref.dtype)


def _mlp_kernel(x_ref, w_ref, p_ref, o_ref, *scratch,
                use_norm, true_h, hp, use_acc):
    if use_acc:
        # Weight streamed over the K grid axis; accumulate in f32 scratch.
        acc_ref = scratch[0]
        k = pl.program_id(1)

        @pl.when(k == 0)
        def _():
            acc_ref[...] = jnp.zeros_like(acc_ref)

        acc_ref[...] += jnp.dot(x_ref[...], w_ref[...],
                                preferred_element_type=jnp.float32)

        @pl.when(k == pl.num_programs(1) - 1)
        def _():
            _epilogue(acc_ref[...], p_ref, o_ref,
                      use_norm=use_norm, true_h=true_h, hp=hp)
    else:
        # Resident-weight path: single matmul + fused epilogue.
        y = jnp.dot(x_ref[...], w_ref[...], preferred_element_type=jnp.float32)
        _epilogue(y, p_ref, o_ref, use_norm=use_norm, true_h=true_h, hp=hp)


def mlp_simple_forward(x, weight, bias, gamma, beta, *, use_norm=True,
                       tile_b=None, compute_dtype=None):
    """Pallas implementation of mlp_simple.forward.

    x:      [B, D]   activations
    weight: [H, D]   torch nn.Linear layout
    bias:   [H]
    gamma:  [H]      LayerNorm weight
    beta:   [H]      LayerNorm bias
    compute_dtype: jnp.bfloat16 is recommended on v5e/v6e/v7x (full-rate bf16
        MXU everywhere, half the HBM traffic for x/W); accumulation and all
        LayerNorm math stay f32.  Default keeps x.dtype (bit-closest to torch).
    """
    B, D = x.shape
    H = weight.shape[0]
    out_dtype = x.dtype
    if compute_dtype is None:
        compute_dtype = x.dtype
    compute_dtype = jnp.dtype(compute_dtype)
    ci = compute_dtype.itemsize
    oi = jnp.dtype(out_dtype).itemsize

    Hp = _round_up(H, 128)                    # lane-dense output (unmasked vst)

    vmem_cap = _vmem_capacity_bytes()
    usable = vmem_cap - (8 << 20)             # headroom for Mosaic scratch/sems
    single_buf = _single_buffer_supported()

    # ---- batch tile ---------------------------------------------------------
    granule = 16 if ci < 4 else 8             # sublane granule (packed 16-bit: 16)
    cap = 512 if usable >= (100 << 20) else 256   # bigger tiles on 128-MiB chips
    if tile_b is None:
        tile_b = min(cap, _round_up(B, granule))
        # Bound the (tile_b, Hp) f32 accumulator / y intermediate to ~8 MiB.
        acc_cap = max(granule, ((8 << 20) // (Hp * 4)) // granule * granule)
        tile_b = max(granule, min(tile_b, acc_cap))
        # Align to the MXU edge when the matmul is likely compute-bound.
        if D >= 512 and tile_b >= 128:
            tile_b = min(cap, _round_up(tile_b, 128))
        # Guarantee >= 2 grid steps so both v7x TensorCores get work.
        if pl.cdiv(B, tile_b) == 1 and B > granule:
            tile_b = max(granule, _round_up(pl.cdiv(tile_b, 2), granule))
    nb = pl.cdiv(B, tile_b)

    # ---- resident weight vs. K-streaming fit check --------------------------
    w_bufs_resident = 1 if single_buf else 2
    resident_bytes = (w_bufs_resident * D * Hp * ci    # resident [D, Hp] weight
                      + 2 * tile_b * D * ci            # x tiles (double-buffered)
                      + 2 * tile_b * Hp * oi           # out tiles (double-buffered)
                      + 2 * tile_b * Hp * 4            # f32 y / LN intermediates
                      + 2 * 8 * Hp * 4)                # packed bias/gamma/beta slab
    stream_k = resident_bytes > int(0.6 * usable)

    if stream_k:
        # Stream the weight over a K grid axis; bound each block to ~1/4 VMEM.
        max_tk = max(128, (int(0.25 * usable) // max(Hp * ci, 1)) // 128 * 128)
        tile_k = min(_round_up(D, 128), max_tk)
        Dp = _round_up(D, tile_k)              # pad K so no ragged K block mixes garbage
        # TODO(synk): if Hp alone is so large that even a 128-row weight block
        # overflows VMEM, an Hp (N) grid axis with a second LN pass is needed.
    else:
        tile_k, Dp = D, D
    nk = pl.cdiv(Dp, tile_k)
    use_acc = nk > 1

    # ---- wrapper-side layout (one pass over W, amortized over the batch) ----
    xp = x.astype(compute_dtype)
    wt = weight.T.astype(compute_dtype)        # [D, H]  -> MXU-native [K, N]
    pad_h, pad_d = Hp - H, Dp - D
    if pad_h or pad_d:
        wt = jnp.pad(wt, ((0, pad_d), (0, pad_h)))
    if pad_d:
        xp = jnp.pad(xp, ((0, 0), (0, pad_d)))  # only in the rare streaming path
    params = jnp.stack([
        jnp.pad(bias.astype(jnp.float32), (0, pad_h)),
        jnp.pad(gamma.astype(jnp.float32), (0, pad_h)),
        jnp.pad(beta.astype(jnp.float32), (0, pad_h)),
    ])                                          # (3, Hp): one constant operand / DMA

    kernel = functools.partial(_mlp_kernel, use_norm=use_norm,
                               true_h=H, hp=Hp, use_acc=use_acc)

    const_mode = dict(pipeline_mode=pl.Buffered(1)) if single_buf else {}
    w_mode = const_mode if nk == 1 else {}      # double-buffer W only when streamed

    grid_spec = pltpu.PrefetchScalarGridSpec(
        num_scalar_prefetch=0,
        grid=(nb, nk),
        in_specs=[
            pl.BlockSpec((tile_b, tile_k), lambda i, k: (i, k)),          # x
            pl.BlockSpec((tile_k, Hp), lambda i, k: (k, 0), **w_mode),    # W^T
            pl.BlockSpec((3, Hp), lambda i, k: (0, 0), **const_mode),     # b/g/beta
        ],
        out_specs=pl.BlockSpec((tile_b, Hp), lambda i, k: (i, 0)),
        scratch_shapes=([pltpu.VMEM((tile_b, Hp), jnp.float32)] if use_acc else []),
    )

    w_bufs = 1 if (nk == 1 and single_buf) else 2
    needed = (w_bufs * tile_k * Hp * ci
              + 2 * tile_b * tile_k * ci
              + 2 * tile_b * Hp * oi
              + (tile_b * Hp * 4 if use_acc else 0)    # accumulator scratch
              + 2 * tile_b * Hp * 4                    # f32 y / LN temps
              + (1 if single_buf else 2) * 8 * Hp * 4)
    vmem_limit = int(min(usable, max(32 << 20, needed * 3 // 2)))

    out = pl.pallas_call(
        kernel,
        out_shape=jax.ShapeDtypeStruct((B, Hp), out_dtype),
        grid_spec=grid_spec,
        compiler_params=pltpu.CompilerParams(
            dimension_semantics=("parallel", "arbitrary"),
            vmem_limit_bytes=vmem_limit,
        ),
    )(xp, wt, params)

    return out if Hp == H else out[:, :H]


def _reference(x, weight, bias, gamma, beta, use_norm=True):
    y = x @ weight.T + bias
    if use_norm:
        mean = jnp.mean(y, axis=-1, keepdims=True)
        var = jnp.mean((y - mean) ** 2, axis=-1, keepdims=True)
        y = (y - mean) / jnp.sqrt(var + LN_EPS)
        y = y * gamma + beta
        y = jnp.maximum(y, 0.0)
    return y


if __name__ == "__main__":
    # Small shapes consistent with the module: batch=16, input_dim=16, hidden_dim=32
    B, D, H = 16, 16, 32
    key = jax.random.PRNGKey(0)
    kx, kw, kb = jax.random.split(key, 3)

    x = jax.random.normal(kx, (B, D), dtype=jnp.float32)

    # Deterministic synthetic parameter init (torch-Linear-like uniform bound)
    bound = 1.0 / (D ** 0.5)
    weight = jax.random.uniform(kw, (H, D), jnp.float32, -bound, bound)
    bias = jax.random.uniform(kb, (H,), jnp.float32, -bound, bound)
    gamma = jnp.ones((H,), jnp.float32)   # LayerNorm default init
    beta = jnp.zeros((H,), jnp.float32)

    out = jax.block_until_ready(
        mlp_simple_forward(x, weight, bias, gamma, beta, use_norm=True)
    )
    ref = _reference(x, weight, bias, gamma, beta, use_norm=True)
    assert out.shape == (B, H)
    assert jnp.allclose(out, ref, atol=1e-5, rtol=1e-5), "mismatch vs reference (norm)"

    # Also exercise the use_norm=False path (linear only, no ReLU)
    out_nonorm = jax.block_until_ready(
        mlp_simple_forward(x, weight, bias, gamma, beta, use_norm=False)
    )
    ref_nonorm = _reference(x, weight, bias, gamma, beta, use_norm=False)
    assert jnp.allclose(out_nonorm, ref_nonorm, atol=1e-5, rtol=1e-5), "mismatch (no norm)"

    print("KERNEL_OK")
</pallas_src>

<mosaic_0001>
module attributes {stable_mosaic.version = 11 : i64} {
  func.func @_copy(%arg0: i32, %arg1: memref<8x128xf32, #tpu.memory_space<vmem>>, %arg2: memref<8x128xf32, #tpu.memory_space<vmem>>) attributes {dimension_semantics = [#tpu.dimension_semantics<arbitrary>], iteration_bounds = array<i64: 1>, scalar_prefetch = 0 : i64, scratch_operands = 0 : i64, tpu.core_type = #tpu.core_type<tc>, window_params = [{pipeline_mode = #tpu.pipeline_mode<synchronous>, transform_indices = @transform_0, window_bounds = array<i64: 8, 128>}, {pipeline_mode = #tpu.pipeline_mode<synchronous>, transform_indices = @transform_1, window_bounds = array<i64: 8, 128>}]} {
    %c0 = arith.constant 0 : index
    %c0_0 = arith.constant 0 : index
    %0 = vector.load %arg1[%c0, %c0_0] : memref<8x128xf32, #tpu.memory_space<vmem>>, vector<8x128xf32>
    %c0_1 = arith.constant 0 : index
    %c0_2 = arith.constant 0 : index
    %1 = vector.load %arg2[%c0_1, %c0_2] : memref<8x128xf32, #tpu.memory_space<vmem>>, vector<8x128xf32>
    tpu.vector_store %arg2[%c0_1, %c0_2], %0 {strides = array<i32>} : memref<8x128xf32, #tpu.memory_space<vmem>>, vector<8x128xf32>,
    return
  }
  func.func @transform_0(%arg0: i32) -> (i32, i32) {
    %c0_i32 = arith.constant 0 : i32
    %c0_i32_0 = arith.constant 0 : i32
    %c0_i32_1 = arith.constant 0 : i32
    return %c0_i32, %c0_i32_0 : i32, i32
  }
  func.func @transform_1(%arg0: i32) -> (i32, i32) {
    %c0_i32 = arith.constant 0 : i32
    %c0_i32_0 = arith.constant 0 : i32
    %c0_i32_1 = arith.constant 0 : i32
    return %c0_i32, %c0_i32_0 : i32, i32
  }
}

module attributes {stable_mosaic.version = 11 : i64} {
  func.func @_mlp_kernel(%arg0: i32, %arg1: i32, %arg2: memref<8x16xf32, #tpu.memory_space<vmem>>, %arg3: memref<16x128xf32, #tpu.memory_space<vmem>>, %arg4: memref<3x128xf32, #tpu.memory_space<vmem>>, %arg5: memref<8x128xf32, #tpu.memory_space<vmem>>) attributes {dimension_semantics = [#tpu.dimension_semantics<parallel>, #tpu.dimension_semantics<arbitrary>], iteration_bounds = array<i64: 2, 1>, scalar_prefetch = 0 : i64, scratch_operands = 0 : i64, tpu.core_type = #tpu.core_type<tc>, window_params = [{transform_indices = @transform_0, window_bounds = array<i64: 8, 16>}, {transform_indices = @transform_1, window_bounds = array<i64: 16, 128>}, {pipeline_mode = #tpu.pipeline_mode<synchronous>, transform_indices = @transform_2, window_bounds = array<i64: 3, 128>}, {transform_indices = @transform_3, window_bounds = array<i64: 8, 128>}]} {
    %c0 = arith.constant 0 : index
    %c0_0 = arith.constant 0 : index
    %0 = vector.load %arg2[%c0, %c0_0] : memref<8x16xf32, #tpu.memory_space<vmem>>, vector<8x16xf32>
    %c0_1 = arith.constant 0 : index
    %c0_2 = arith.constant 0 : index
    %1 = vector.load %arg3[%c0_1, %c0_2] : memref<16x128xf32, #tpu.memory_space<vmem>>, vector<16x128xf32>
    %cst = arith.constant dense<0.000000e+00> : vector<8x128xf32>
    %2 = tpu.matmul %0, %1, %cst {dimension_numbers = #tpu.dot_dimension_numbers<[1], [0], [0], [1], [0, 0, 1, 1], [], []>} : vector<8x16xf32>, vector<16x128xf32>, vector<8x128xf32> -> vector<8x128xf32>
    %c0_3 = arith.constant 0 : index
    %c0_4 = arith.constant 0 : index
    %3 = vector.load %arg4[%c0_3, %c0_4] : memref<3x128xf32, #tpu.memory_space<vmem>>, vector<1x128xf32>
    %4 = vector.broadcast %3 : vector<1x128xf32> to vector<8x128xf32>
    %5 = arith.addf %2, %4 : vector<8x128xf32>
    %cst_5 = arith.constant dense<0.000000e+00> : vector<8xf32>
    %6 = vector.multi_reduction <add>, %5, %cst_5 [1] : vector<8x128xf32> to vector<8xf32>
    %7 = vector.shape_cast %6 : vector<8xf32> to vector<8x1xf32>
    %cst_6 = arith.constant 3.125000e-02 : f32
    %8 = vector.broadcast %cst_6 : f32 to vector<8x1xf32>
    %9 = arith.mulf %7, %8 : vector<8x1xf32>
    %10 = vector.broadcast %9 : vector<8x1xf32> to vector<8x128xf32>
    %11 = arith.subf %5, %10 : vector<8x128xf32>
    %12 = tpu.iota {dimensions = array<i32: 1>} : vector<8x128xi32>
    %c32_i32 = arith.constant 32 : i32
    %13 = vector.broadcast %c32_i32 : i32 to vector<8x128xi32>
    %14 = arith.cmpi slt, %12, %13 : vector<8x128xi32>
    %cst_7 = arith.constant 0.000000e+00 : f32
    %15 = vector.broadcast %cst_7 : f32 to vector<8x128xf32>
    %16 = arith.select %14, %11, %15 : vector<8x128xi1>, vector<8x128xf32>
    %17 = arith.mulf %16, %16 : vector<8x128xf32>
    %cst_8 = arith.constant dense<0.000000e+00> : vector<8xf32>
    %18 = vector.multi_reduction <add>, %17, %cst_8 [1] : vector<8x128xf32> to vector<8xf32>
    %19 = vector.shape_cast %18 : vector<8xf32> to vector<8x1xf32>
    %cst_9 = arith.constant 3.125000e-02 : f32
    %20 = vector.broadcast %cst_9 : f32 to vector<8x1xf32>
    %21 = arith.mulf %19, %20 : vector<8x1xf32>
    %cst_10 = arith.constant 9.99999974E-6 : f32
    %22 = vector.broadcast %cst_10 : f32 to vector<8x1xf32>
    %23 = arith.addf %21, %22 : vector<8x1xf32>
    %24 = math.rsqrt %23 : vector<8x1xf32>
    %25 = vector.broadcast %24 : vector<8x1xf32> to vector<8x128xf32>
    %26 = arith.mulf %16, %25 : vector<8x128xf32>
    %c1 = arith.constant 1 : index
    %c0_11 = arith.constant 0 : index
    %27 = vector.load %arg4[%c1, %c0_11] : memref<3x128xf32, #tpu.memory_space<vmem>>, vector<1x128xf32>
    %28 = vector.broadcast %27 : vector<1x128xf32> to vector<8x128xf32>
    %29 = arith.mulf %26, %28 : vector<8x128xf32>
    %c2 = arith.constant 2 : index
    %c0_12 = arith.constant 0 : index
    %30 = vector.load %arg4[%c2, %c0_12] : memref<3x128xf32, #tpu.memory_space<vmem>>, vector<1x128xf32>
    %31 = vector.broadcast %30 : vector<1x128xf32> to vector<8x128xf32>
    %32 = arith.addf %29, %31 : vector<8x128xf32>
    %cst_13 = arith.constant 0.000000e+00 : f32
    %33 = vector.broadcast %cst_13 : f32 to vector<8x128xf32>
    %34 = arith.maximumf %32, %33 : vector<8x128xf32>
    %c0_14 = arith.constant 0 : index
    %c0_15 = arith.constant 0 : index
    %35 = vector.load %arg5[%c0_14, %c0_15] : memref<8x128xf32, #tpu.memory_space<vmem>>, vector<8x128xf32>
    tpu.vector_store %arg5[%c0_14, %c0_15], %34 {strides = array<i32>} : memref<8x128xf32, #tpu.memory_space<vmem>>, vector<8x128xf32>,
    return
  }
  func.func @transform_0(%arg0: i32, %arg1: i32) -> (i32, i32) {
    %c0_i32 = arith.constant 0 : i32
    return %arg0, %arg1 : i32, i32
  }
  func.func @transform_1(%arg0: i32, %arg1: i32) -> (i32, i32) {
    %c0_i32 = arith.constant 0 : i32
    %c0_i32_0 = arith.constant 0 : i32
    return %arg1, %c0_i32 : i32, i32
  }
  func.func @transform_2(%arg0: i32, %arg1: i32) -> (i32, i32) {
    %c0_i32 = arith.constant 0 : i32
    %c0_i32_0 = arith.constant 0 : i32
    %c0_i32_1 = arith.constant 0 : i32
    return %c0_i32, %c0_i32_0 : i32, i32
  }
  func.func @transform_3(%arg0: i32, %arg1: i32) -> (i32, i32) {
    %c0_i32 = arith.constant 0 : i32
    %c0_i32_0 = arith.constant 0 : i32
    return %arg0, %c0_i32 : i32, i32
  }
}

</mosaic_0001>

<bundles_post_ra>
// kernel: tpu_custom_call.1
= control target key start
LH: loop header
LB: loop body
LE: loop exit
PB: predicated region body
PF: predicated region fallthrough
CT: control target
= control target key end

     0   :  { %6 = vsyncpa [#allocation3], 0  ;;  %s114_s0 = inlined_call_operand.hbm [shape: f32[8,128], index: 0, kind: input, shape index: {}]   ;;  %s115_s1 = inlined_call_operand.hbm [shape: f32[8,128], index: 1, kind: output, shape index: {}]  }
   0x1   :  { %7 = vsyncpa [#allocation4], 0  ;;  %s13_s8 = sshll.u32 %s114_s0, 4  ;;  %s96_s9 = smov [#allocation2]   ;;  %s14_s8 = int_to_ptr.hbm [resolvable:$true] %s13_s8 }
   0x2   :  { %s15_s10 = sshll.u32 %s96_s9, 4  ;;  %s16_s10 = int_to_ptr.vmem [resolvable:$true] %s15_s10 }
   0x3   :  { %18 = dma.hbm_to_vmem [thread:$0]  %s14_s8, 128, %s16_s10, [#allocation3]  }
   0x4   :  { %92 = dma.done.wait [#allocation3], 128  }
   0x5   :  { %93 = vsyncadd [#allocation3], 4294967168  ;;  %s97_s11 = smov [#allocation5]   ;;  %s32_s15 = sshll.u32 %s115_s1, 4  ;;  %v23_v0 = vld [vmem:[#allocation2] sm:$0xff]  ;;  %s33_s15 = int_to_ptr.hbm [resolvable:$true] %s32_s15 }
   0x6   :  { %s30_s12 = sshll.u32 %s97_s11, 4  ;;  %24 = vst [vmem:[#allocation5] sm:$0xff] %v23_v0  ;;  %s31_s12 = int_to_ptr.vmem [resolvable:$true] %s30_s12 }
   0x7   :  { %35 = dma.vmem_to_hbm [thread:$0]  %s31_s12, 128, %s33_s15, [#allocation4]  }
   0x8   :  { %94 = dma.done.wait [#allocation4], 128  }
   0x9   :  { %95 = vsyncadd [#allocation4], 4294967168 }
   0xa   :  { %40 = vsyncpa [#allocation3], 1 }
   0xb   :  { %41 = vsyncpa [#allocation4], 1 }

// kernel: tpu_custom_call.1
= control target key start
LH: loop header
LB: loop body
LE: loop exit
PB: predicated region body
PF: predicated region fallthrough
CT: control target
= control target key end

     0   :  { %8 = vsyncpa [#allocation3], 0  ;;  %s878_s0 = inlined_call_operand.hbm [shape: f32[16,16], index: 0, kind: input, shape index: {}]   ;;  %s879_s1 = inlined_call_operand.hbm [shape: f32[16,128], index: 1, kind: input, shape index: {}]   ;;  %s880_s2 = inlined_call_operand.hbm [shape: f32[3,128], index: 2, kind: input, shape index: {}]   ;;  %s881_s3 = inlined_call_operand.hbm [shape: f32[16,128], index: 3, kind: output, shape index: {}]  }
   0x1   :  { %10 = vsyncpa [#allocation3 + $0x1], 0 }
   0x2   :  { %11 = vsyncpa [#allocation6], 0 }
   0x3   :  { %12 = vsyncpa [#allocation4], 0 }
   0x4   :  { %14 = vsyncpa [#allocation4 + $0x1], 0  ;;  %s730_s12 = smov 0   ;;  %s732_s13 = smov 0  }
   0x5   :  { %s734_s14 = smov 0   ;;  %s736_s15 = smov 0  }
   0x6   :  { %s738_s16 = smov 0   ;;  %s740_s17 = smov 0  }
   0x7 LB: > { %s420_s18 = sadd.s32 4294967295, %s704_s17   ;;  %p422_p0 = scmp.ge.s32.totalorder %s704_s17, 1  ;;  %s704_s17 = sphi %s740_s17, %s20_s17   ;;  %s700_s16 = sphi %s738_s16, %s891_s16   ;;  %s696_s15 = sphi %s736_s15, %s890_s15   ;;  %s692_s14 = sphi %s734_s14, %s889_s14   ;;  %s688_s13 = sphi %s732_s13, %s888_s13   ;;  %s684_s12 = sphi %s730_s12, %s887_s12  }
   0x8   : > { %p764_p1 = scmp.eq.s32.totalorder %s420_s18, 0  ;;  %p138_p2 = scmp.lt.s32.totalorder %s704_s17, 3 }
   0x9   : > { %s152_s22 = sshll.u32 %s879_s1, 4  ;;  %s706_s24 = smov [#allocation5]   ;;  %s153_s22 = int_to_ptr.hbm [resolvable:$true] %s152_s22 }
   0xa   : > { %p772_p3 = pnand %p422_p0, %p138_p2  ;;  %s154_s25 = sshll.u32 %s706_s24, 4  ;;  %s155_s25 = int_to_ptr.vmem [resolvable:$true] %s154_s25 }
   0xb   : > { %p425_p6 = scmp.ge.s32.totalorder %s704_s17, 2  ;;  %s167_s28 = sshll.u32 %s880_s2, 4  ;;  %s168_s28 = int_to_ptr.hbm [resolvable:$true] %s167_s28 }
   0xc   : > { %p450_p4 = pneg %p772_p3  ;;  %s707_s29 = smov 128  }
   0xd   : > { %s708_s30 = smov 8   ;;  %s709_s4 = smov [#allocation7]  }
   0xe   : > { %p451_p5 = pnand %p450_p4, %p764_p1  ;;  %s169_s5 = sshll.u32 %s709_s4, 4  ;;  %s170_s5 = int_to_ptr.vmem [resolvable:$true] %s169_s5 }
   0xf   : > { %s32_s6 = sadd.s32 1, %s700_s16  ;;  %s421_s7 = sadd.s32 4294967294, %s704_s17  }
  0x10   : > { %453 = dma.hbm_to_vmem [thread:$0]  (!%p451_p5), %s153_s22, 256, %s155_s25, [#allocation6], %s707_s29, %s707_s29, %s708_s30  }
  0x11   : > { %456 = dma.hbm_to_vmem [thread:$0]  (!%p451_p5), %s168_s28, 64, %s170_s5, [#allocation6]  }
  0x12   : > { %p34_p7 = scmp.ge.s32.totalorder %s32_s6, 2  ;;  %s41_s8 = sadd.s32 1, %s692_s14 }
  0x13   : > { %p48_p8 = scmp.ne.s32.totalorder %s692_s14, %s688_s13  ;;  %p49_p9 = scmp.eq.s32.totalorder %s704_s17, 0 }
  0x14   : > { %s893_s6 = smov (%p34_p7, %s32_s6), 0  ;;  %p54_p10 = scmp.ne.s32.totalorder %s688_s13, %s684_s12 }
  0x15   : > { %s36_s9 = ssub.s32 %s700_s16, %s893_s6  ;;  %p125_p11 = scmp.eq.s32.totalorder %s420_s18, 1 }
  0x16   : > { %p39_p12 = scmp.eq.s32.totalorder %s36_s9, 0  ;;  %p800_p13 = por %p764_p1, %p54_p10 }
  0x17   : > { %p804_p0 = por %p125_p11, %p48_p8  ;;  %p131_p2 = scmp.eq.s32.totalorder %s421_s7, 1 }
  0x18   : > { %s809_s20 = scalar_select %p39_p12, %s692_s14, %s41_s8  }
  0x19   : > { %p50_p4 = por %p49_p9, %p48_p8  ;;  %p811_p5 = por %p131_p2, %p54_p10 }
  0x1a   : > { %s180_s22 = sand.u32 1, %s692_s14   ;;  %s427_s18 = sshll.u32 %s700_s16, 3 }
  0x1b   : > { %p467_p7 = scmp.lt.s32.totalorder %s704_s17, 2  ;;  %s426_s24 = sshll.u32 %s180_s22, 3 }
  0x1c   : > { %s189_s27 = scalar_lea.hbm %s878_s0, %s427_s18  ;;  %s184_s29 = scalar_lea.vmem [#allocation2], %s426_s24 }
  0x1d   : > { %s191_s28 = sshll.u32 %s189_s27, 4  ;;  %s193_s30 = sshll.u32 %s184_s29, 4  ;;  %s192_s28 = int_to_ptr.hbm [resolvable:$true] %s191_s28  ;;  %s194_s30 = int_to_ptr.vmem [resolvable:$true] %s193_s30 }
  0x1e   : > { %p458_p11 = pnand %p467_p7, %p50_p4  ;;  %s181_s4 = scalar_lea.sflag [#allocation3], %s180_s22 }
  0x1f   : > { %202 = sbr.rel (%p772_p3) target bundleno = 443 (0x1bb), region = 32  ;;  %s824_s5 = sand.u32 (!%p772_p3), 1, %s688_s13  }
  0x20   : > { %460 = dma.hbm_to_vmem [thread:$0]  (!%p458_p11), %s192_s28, 128, %s194_s30, %s181_s4  }
  0x21   : > { %s429_s7 = sshll.u32 (!%p772_p3), %s824_s5, 3  ;;  %s205_s8 = scalar_lea.sflag (!%p772_p3), [#allocation3], %s824_s5 }
  0x22   : > { %s208_s9 = scalar_lea.vmem (!%p772_p3), [#allocation2], %s429_s7 }
  0x24   : > { %671 = dma.done.wait (%p800_p13), %s205_s8, 128  }
  0x25   : > { %673 = vsyncadd (%p800_p13), %s205_s8, 4294967168 }
  0x26   : > { %675 = dma.done.wait (%p764_p1), [#allocation6], 320  }
  0x27   : > { %677 = vsyncadd (%p764_p1), [#allocation6], 4294966976  ;;  %v245_v0 = vld [vmem:[#allocation5 + $0x8] sm:$0xff]  ;;  %v244_v1 = vld [vmem:[#allocation5] sm:$0xff]  ;;  %vm248_vm0 = vcmask 130048   ;;  %v276_v6 = vlaneseq  ;;  %s435_s19 = sshll.u32 %s696_s15, 3 }
  0x28   : > { %266 = vmatpush.msra.mxu0 %v245_v0  ;;  %v243_v2 = vld [vmem:[%s208_s9] sm:$0xff]  ;;  %s315_s22 = scalar_lea.hbm %s881_s3, %s435_s19  ;;  %s241_s18 = scalar_lea.vmem [#allocation8], %s429_s7 }
  0x29   : > { %v523_v3 = vld [vmem:[#allocation7] ss:$0 sm:$0xff]  ;;  %v277_v7 = vand.u32 127, %v276_v6  ;;  %v524_v22 = vld [vmem:[#allocation7 + $0x1] ss:$0 sm:$0xff]  ;;  %s317_s24 = sshll.u32 %s241_s18, 4  ;;  %s318_s24 = int_to_ptr.vmem [resolvable:$true] %s317_s24 }
  0x2a   : > { %267 = vmatpush.msra.mxu0 %v244_v1  ;;  %v525_v25 = vld [vmem:[#allocation7 + $0x2] ss:$0 sm:$0xff]  ;;  %s319_s25 = sshll.u32 %s315_s22, 4  ;;  %s305_s15 = scalar_lea.sflag [#allocation4], %s824_s5  ;;  %s320_s25 = int_to_ptr.hbm [resolvable:$true] %s319_s25 }
  0x2b   : > { %433 = vmatmul.msk.f32.vlgmr.msra.gmra.mxu0 %vm248_vm0, %v243_v2  ;;  %vm278_vm1 = vcmp.lt.s32.totalorder %v277_v7, 32  ;;  %s632_s26 = sshra.s32 %s320_s25, 4  ;;  %s638_s30 = scalar_lea.hbm %s881_s3, 16  ;;  %s633_s26 = int_to_ptr.hbm [resolvable:$true] %s632_s26 }
  0x2c   : > { %s634_s27 = scalar_lea.hbm %s633_s26, 8  ;;  %p639_p9 = scmp.lt.s32.totalorder %s633_s26, %s881_s3 }
  0x2d   : > { %p635_p1 = scmp.ne.s32.totalorder %s633_s26, %s634_s27  ;;  %p640_p10 = scmp.lt.s32.totalorder %s638_s30, %s634_s27 }
  0x2f   : > { %p636_p3 = pnand %p635_p1, %p804_p0  ;;  %p641_p12 = por %p640_p10, %p639_p9 }
  0x31   : > { %p637_p8 = pneg %p636_p3 }
  0x33   : > { %p642_p13 = pnand %p641_p12, %p637_p8 }
  0xa8   : > { %v269_v4 = vpop.f32.mrf.mxu0 }
  0xa9   : > { %v270_v5 = vadd.f32 %v523_v3, %v269_v4 }
  0xab   : > { %272 = vadd.xlane.f32.xlu0 %v270_v5 }
 0x11e   : > { %v273_v8 = vpop.xlane.xlu0 %272 }
 0x11f   : > { %v274_v9 = vmul.f32 0.03125, %v273_v8 }
 0x121   : > { %v275_v10 = vsub.f32 %v270_v5, %v274_v9 }
 0x123   : > { %v279_v11 = vsel %vm278_vm1, %v275_v10, 0.0 }
 0x124   : > { %v280_v12 = vmul.f32 %v279_v11, %v279_v11 }
 0x126   : > { %281 = vadd.xlane.f32.xlu0 %v280_v12 }
 0x199   : > { %v282_v13 = vpop.xlane.xlu0 %281 }
 0x19a   : > { %v283_v14 = vmul.f32 0.03125, %v282_v13 }
 0x19c   : > { %v284_v15 = vadd.f32 1e-05, %v283_v14 }
 0x19e   : > { %526 = vrsqrt.f32 %v284_v15  ;;  %vm291_vm3 = vweird.f32 %v284_v15 }
 0x1a4   : > { %v527_v16 = vpop.eup %526 }
 0x1a5   : > { %v286_v17 = vmul.f32 %v527_v16, %v284_v15  ;;  %vm292_vm2 = vweird.f32 %v527_v16 }
 0x1a6   : > { %vm293_vm4 = vmor %vm291_vm3, %vm292_vm2 }
 0x1a7   : > { %v287_v18 = vmul.f32 %v527_v16, %v286_v17 }
 0x1a9   : > { %v288_v19 = vmul.f32 0.5, %v287_v18 }
 0x1ab   : > { %v289_v20 = vsub.f32 1.5, %v288_v19 }
 0x1ad   : > { %v290_v21 = vmul.f32 %v527_v16, %v289_v20 }
 0x1af   : > { %v294_v23 = vsel %vm293_vm4, %v527_v16, %v290_v21 }
 0x1b0   : > { %v295_v24 = vmul.f32 %v294_v23, %v279_v11 }
 0x1b2   : > { %v298_v26 = vmul.f32 %v524_v22, %v295_v24 }
 0x1b4   : > { %v301_v27 = vadd.f32 %v525_v25, %v298_v26 }
 0x1b6   : > { %v302_v28 = vmax.f32 %v301_v27, 0.0 }
 0x1b8   : > { %303 = vst [vmem:[%s241_s18] sm:$0xff] %v302_v28 }
 0x1b9   : > { %645 = shalt.err (!%p642_p13)
}
 0x1ba   : > { %448 = dma.vmem_to_hbm [thread:$0]  (%p804_p0), %s318_s24, 128, %s320_s25, %s305_s15  }
 0x1bb PF: > { %s331_s5 = sand.u32 1, %s684_s12   ;;  %p462_p2 = pnand %p425_p6, %p811_p5 }
 0x1bc   : > { %s332_s8 = scalar_lea.sflag [#allocation4], %s331_s5 }
 0x1bd   : > { %p463_p4 = pneg %p462_p2 }
 0x1bf   : > { %679 = dma.done.wait (%p463_p4), %s332_s8, 128  }
 0x1c0   : > { %681 = vsyncadd (%p463_p4), %s332_s8, 4294967168  ;;  %s20_s17 = sadd.s32 1, %s704_s17   ;;  %s887_s12 = smov %s688_s13 }
 0x1c1   : > { %p17_p7 = scmp.ge.s32.totalorder %s20_s17, 4   ;;  %s888_s13 = smov %s692_s14 }
 0x1c2   : > { %s889_s14 = smov %s809_s20  ;;  %s890_s15 = smov %s700_s16 }
 0x1c3   : > { %s891_s16 = smov %s893_s6  ;;  %19 = sbr.rel (!%p17_p7) target bundleno = 7 (0x7), region = 86 }
 0x1c8   :  { %338 = vsyncpa [#allocation3], 1 }
 0x1c9   :  { %340 = vsyncpa [#allocation3 + $0x1], 1 }
 0x1ca   :  { %341 = vsyncpa [#allocation6], 1 }
 0x1cb   :  { %342 = vsyncpa [#allocation4], 1 }
 0x1cc   :  { %344 = vsyncpa [#allocation4 + $0x1], 1 }

</bundles_post_ra>
